<compile_context>
chip_gen: v7x
topology: tpu7x:2x2x1
jax: 0.10.0
libtpu: 0.0.40
codegen_flags: <defaults>
</compile_context>

<pallas_src>
import jax
import jax.numpy as jnp
from jax import lax
from jax.experimental import pallas as pl
from jax.experimental.pallas import tpu as pltpu


def mlp_kernel(x_ref, w1_ref, b1_ref, w2_ref, b2_ref, o_ref):
    # Hidden layer: (TB, K_pad) @ (K_pad, 256) -> f32 accumulation on the MXU.
    h = jnp.dot(x_ref[...], w1_ref[...], preferred_element_type=jnp.float32)
    h = jnp.maximum(h + b1_ref[...], 0.0)  # bias broadcast (1, 256); ReLU on VPU

    # Output layer: contract on the lane-dense 256 axis. w2_ref is (N_pad=128, 256),
    # i.e. PyTorch's native (out, in) layout zero-padded on the out axis — no transpose.
    o = lax.dot_general(
        h.astype(w2_ref.dtype), w2_ref[...],
        dimension_numbers=(((1,), (1,)), ((), ())),
        preferred_element_type=jnp.float32,
    )
    o_ref[...] = (o + b2_ref[...]).astype(o_ref.dtype)  # (TB, 128) lane-dense store


def mlp_forward(x, w1, b1, w2, b2, *, block_b=512, compute_dtype=jnp.bfloat16):
    """PyTorch semantics y = relu(x @ w1.T + b1) @ w2.T + b2.

    x: (B, 20); w1: (256, 20); b1: (256,); w2: (10, 256); b2: (10,).
    Returns (B, 10) float32.
    """
    B, in_f = x.shape
    hid_f = w1.shape[0]
    out_f = w2.shape[0]

    K_pad = 32    # in_f 20 -> 32 (tile-friendly contraction width; zeros are harmless)
    N_pad = 128   # out_f 10 -> 128 (lane-dense output => unmasked vector stores)

    def round_up(a, m):
        return ((a + m - 1) // m) * m

    TB = min(block_b, round_up(B, 8))        # batch tile, multiple of 8, capped
    B_pad = round_up(B, TB)

    # --- operand prep (zero padding + bf16 MXU operands, f32 biases) ---
    x_p = jnp.zeros((B_pad, K_pad), compute_dtype).at[:B, :in_f].set(
        x.astype(compute_dtype))
    w1_t = jnp.zeros((K_pad, hid_f), compute_dtype).at[:in_f, :].set(
        w1.T.astype(compute_dtype))                       # (32, 256), lane-dense
    b1_r = b1.reshape(1, hid_f).astype(jnp.float32)       # (1, 256)
    w2_p = jnp.zeros((N_pad, hid_f), compute_dtype).at[:out_f, :].set(
        w2.astype(compute_dtype))                         # (128, 256), no transpose
    b2_r = jnp.zeros((1, N_pad), jnp.float32).at[:, :out_f].set(
        b2.astype(jnp.float32))                           # (1, 128)

    grid = (B_pad // TB,)

    itemsize = jnp.dtype(compute_dtype).itemsize
    flops = 2 * B_pad * (K_pad * hid_f + hid_f * N_pad)
    bytes_accessed = (
        B_pad * K_pad * itemsize                # x read
        + K_pad * hid_f * itemsize              # w1 read
        + N_pad * hid_f * itemsize              # w2 read
        + (hid_f + N_pad) * 4                   # biases
        + B_pad * N_pad * 4                     # output write
    )

    out = pl.pallas_call(
        mlp_kernel,
        out_shape=jax.ShapeDtypeStruct((B_pad, N_pad), jnp.float32),
        grid=grid,
        in_specs=[
            pl.BlockSpec((TB, K_pad), lambda i: (i, 0)),     # x: tiled over batch
            pl.BlockSpec((K_pad, hid_f), lambda i: (0, 0)),  # w1: VMEM-resident
            pl.BlockSpec((1, hid_f), lambda i: (0, 0)),      # b1: VMEM-resident
            pl.BlockSpec((N_pad, hid_f), lambda i: (0, 0)),  # w2: VMEM-resident
            pl.BlockSpec((1, N_pad), lambda i: (0, 0)),      # b2: VMEM-resident
        ],
        out_specs=pl.BlockSpec((TB, N_pad), lambda i: (i, 0)),
        compiler_params=pltpu.CompilerParams(
            dimension_semantics=("parallel",)),
        cost_estimate=pl.CostEstimate(
            flops=flops, transcendentals=0, bytes_accessed=bytes_accessed),
    )(x_p, w1_t, b1_r, w2_p, b2_r)

    return out[:B, :out_f]


def _reference(x, w1, b1, w2, b2):
    return jnp.maximum(x @ w1.T + b1, 0.0) @ w2.T + b2


if __name__ == "__main__":
    key = jax.random.PRNGKey(0)
    k_x, k_w1, k_b1, k_w2, k_b2, k_x2 = jax.random.split(key, 6)

    in_f, hid_f, out_f = 20, 256, 10

    # Deterministic synthetic parameters (same shapes as the PyTorch module's __init__).
    w1 = jax.random.normal(k_w1, (hid_f, in_f), dtype=jnp.float32) * 0.05
    b1 = jax.random.normal(k_b1, (hid_f,), dtype=jnp.float32) * 0.05
    w2 = jax.random.normal(k_w2, (out_f, hid_f), dtype=jnp.float32) * 0.05
    b2 = jax.random.normal(k_b2, (out_f,), dtype=jnp.float32) * 0.05

    # Small-batch check (batch=2, single grid step).
    x = jax.random.normal(k_x, (2, in_f), dtype=jnp.float32)
    out = mlp_forward(x, w1, b1, w2, b2)
    jax.block_until_ready(out)
    ref = _reference(x, w1, b1, w2, b2)
    assert out.shape == (2, out_f)
    assert jnp.allclose(out, ref, atol=3e-2, rtol=3e-2), "small-batch mismatch"

    # Larger batch with a non-dividing tile (exercises the batch grid + padding path).
    x2 = jax.random.normal(k_x2, (40, in_f), dtype=jnp.float32)
    out2 = mlp_forward(x2, w1, b1, w2, b2, block_b=16)   # B_pad=48, grid=(3,)
    jax.block_until_ready(out2)
    ref2 = _reference(x2, w1, b1, w2, b2)
    assert out2.shape == (40, out_f)
    assert jnp.allclose(out2, ref2, atol=3e-2, rtol=3e-2), "batched-grid mismatch"

    print("KERNEL_OK")
</pallas_src>

<mosaic_0001>
module attributes {stable_mosaic.version = 11 : i64} {
  func.func @mlp_kernel(%arg0: i32, %arg1: memref<8x32xbf16, #tpu.memory_space<vmem>>, %arg2: memref<32x256xbf16, #tpu.memory_space<vmem>>, %arg3: memref<1x256xf32, #tpu.memory_space<vmem>>, %arg4: memref<128x256xbf16, #tpu.memory_space<vmem>>, %arg5: memref<1x128xf32, #tpu.memory_space<vmem>>, %arg6: memref<8x128xf32, #tpu.memory_space<vmem>>) attributes {dimension_semantics = [#tpu.dimension_semantics<parallel>], iteration_bounds = array<i64: 1>, scalar_prefetch = 0 : i64, scratch_operands = 0 : i64, tpu.core_type = #tpu.core_type<tc>, window_params = [{transform_indices = @transform_0, window_bounds = array<i64: 8, 32>}, {pipeline_mode = #tpu.pipeline_mode<synchronous>, transform_indices = @transform_1, window_bounds = array<i64: 32, 256>}, {pipeline_mode = #tpu.pipeline_mode<synchronous>, transform_indices = @transform_2, window_bounds = array<i64: 1, 256>}, {pipeline_mode = #tpu.pipeline_mode<synchronous>, transform_indices = @transform_3, window_bounds = array<i64: 128, 256>}, {pipeline_mode = #tpu.pipeline_mode<synchronous>, transform_indices = @transform_4, window_bounds = array<i64: 1, 128>}, {transform_indices = @transform_5, window_bounds = array<i64: 8, 128>}]} {
    %c0 = arith.constant 0 : index
    %c0_0 = arith.constant 0 : index
    %0 = vector.load %arg1[%c0, %c0_0] : memref<8x32xbf16, #tpu.memory_space<vmem>>, vector<8x32xbf16>
    %c0_1 = arith.constant 0 : index
    %c0_2 = arith.constant 0 : index
    %1 = vector.load %arg2[%c0_1, %c0_2] : memref<32x256xbf16, #tpu.memory_space<vmem>>, vector<32x256xbf16>
    %cst = arith.constant dense<0.000000e+00> : vector<8x256xf32>
    %2 = tpu.matmul %0, %1, %cst {dimension_numbers = #tpu.dot_dimension_numbers<[1], [0], [0], [1], [0, 0, 1, 1], [], []>} : vector<8x32xbf16>, vector<32x256xbf16>, vector<8x256xf32> -> vector<8x256xf32>
    %c0_3 = arith.constant 0 : index
    %c0_4 = arith.constant 0 : index
    %3 = vector.load %arg3[%c0_3, %c0_4] : memref<1x256xf32, #tpu.memory_space<vmem>>, vector<1x256xf32>
    %4 = vector.broadcast %3 : vector<1x256xf32> to vector<8x256xf32>
    %5 = arith.addf %2, %4 : vector<8x256xf32>
    %cst_5 = arith.constant 0.000000e+00 : f32
    %6 = vector.broadcast %cst_5 : f32 to vector<8x256xf32>
    %7 = arith.maximumf %5, %6 : vector<8x256xf32>
    %8 = arith.truncf %7 : vector<8x256xf32> to vector<8x256xbf16>
    %c0_6 = arith.constant 0 : index
    %c0_7 = arith.constant 0 : index
    %9 = vector.load %arg4[%c0_6, %c0_7] : memref<128x256xbf16, #tpu.memory_space<vmem>>, vector<128x256xbf16>
    %cst_8 = arith.constant dense<0.000000e+00> : vector<8x128xf32>
    %10 = tpu.matmul %8, %9, %cst_8 {dimension_numbers = #tpu.dot_dimension_numbers<[1], [1], [0], [0], [0, 0, 1, 0], [], []>} : vector<8x256xbf16>, vector<128x256xbf16>, vector<8x128xf32> -> vector<8x128xf32>
    %c0_9 = arith.constant 0 : index
    %c0_10 = arith.constant 0 : index
    %11 = vector.load %arg5[%c0_9, %c0_10] : memref<1x128xf32, #tpu.memory_space<vmem>>, vector<1x128xf32>
    %12 = vector.broadcast %11 : vector<1x128xf32> to vector<8x128xf32>
    %13 = arith.addf %10, %12 : vector<8x128xf32>
    %c0_11 = arith.constant 0 : index
    %c0_12 = arith.constant 0 : index
    %14 = vector.load %arg6[%c0_11, %c0_12] : memref<8x128xf32, #tpu.memory_space<vmem>>, vector<8x128xf32>
    tpu.vector_store %arg6[%c0_11, %c0_12], %13 {strides = array<i32>} : memref<8x128xf32, #tpu.memory_space<vmem>>, vector<8x128xf32>,
    return
  }
  func.func @transform_0(%arg0: i32) -> (i32, i32) {
    %c0_i32 = arith.constant 0 : i32
    %c0_i32_0 = arith.constant 0 : i32
    return %arg0, %c0_i32 : i32, i32
  }
  func.func @transform_1(%arg0: i32) -> (i32, i32) {
    %c0_i32 = arith.constant 0 : i32
    %c0_i32_0 = arith.constant 0 : i32
    %c0_i32_1 = arith.constant 0 : i32
    return %c0_i32, %c0_i32_0 : i32, i32
  }
  func.func @transform_2(%arg0: i32) -> (i32, i32) {
    %c0_i32 = arith.constant 0 : i32
    %c0_i32_0 = arith.constant 0 : i32
    %c0_i32_1 = arith.constant 0 : i32
    return %c0_i32, %c0_i32_0 : i32, i32
  }
  func.func @transform_3(%arg0: i32) -> (i32, i32) {
    %c0_i32 = arith.constant 0 : i32
    %c0_i32_0 = arith.constant 0 : i32
    %c0_i32_1 = arith.constant 0 : i32
    return %c0_i32, %c0_i32_0 : i32, i32
  }
  func.func @transform_4(%arg0: i32) -> (i32, i32) {
    %c0_i32 = arith.constant 0 : i32
    %c0_i32_0 = arith.constant 0 : i32
    %c0_i32_1 = arith.constant 0 : i32
    return %c0_i32, %c0_i32_0 : i32, i32
  }
  func.func @transform_5(%arg0: i32) -> (i32, i32) {
    %c0_i32 = arith.constant 0 : i32
    %c0_i32_0 = arith.constant 0 : i32
    return %arg0, %c0_i32 : i32, i32
  }
}

</mosaic_0001>

<bundles_post_ra>
// kernel: tpu_custom_call.1
= control target key start
LH: loop header
LB: loop body
LE: loop exit
PB: predicated region body
PF: predicated region fallthrough
CT: control target
= control target key end

     0   :  { %10 = vsyncpa [#allocation3], 0  ;;  %s557_s0 = inlined_call_operand.hbm [shape: bf16[8,32], index: 0, kind: input, shape index: {}]   ;;  %s558_s1 = inlined_call_operand.hbm [shape: bf16[32,256], index: 1, kind: input, shape index: {}]   ;;  %s559_s2 = inlined_call_operand.vmem [shape: f32[1,256], index: 2, kind: input, shape index: {}]   ;;  %s560_s3 = inlined_call_operand.hbm [shape: bf16[128,256], index: 3, kind: input, shape index: {}]   ;;  %s561_s4 = inlined_call_operand.vmem [shape: f32[1,128], index: 4, kind: input, shape index: {}]   ;;  %s562_s5 = inlined_call_operand.hbm [shape: f32[8,128], index: 5, kind: output, shape index: {}]  }
   0x1   :  { %11 = vsyncpa [#allocation6], 0 }
   0x2   :  { %12 = vsyncpa [#allocation4], 0  ;;  %s460_s18 = smov [#allocation5]   ;;  %s366_s22 = scalar_lea.hbm %s558_s1, 512 }
   0x3   :  { %s28_s19 = sshll.u32 %s460_s18, 4  ;;  %p367_p0 = scmp.ne.s32.totalorder %s558_s1, %s366_s22  ;;  %s29_s19 = int_to_ptr.vmem [resolvable:$true] %s28_s19 }
   0x4   :  { %p370_p1 = scmp.lt.u32.totalorder %s366_s22, %s558_s1 }
   0x6   :  { %p372_p2 = pnand %p370_p1, %p367_p0 }
   0x8   :  { %375 = shalt.err (!%p372_p2)
}
   0x9   :  { %s376_s27 = scalar_lea.vmem %s29_s19, 512  ;;  %p381_p4 = scmp.lt.s32.totalorder %s29_s19, %s29_s19 }
   0xa   :  { %p377_p3 = scmp.ne.s32.totalorder %s29_s19, %s376_s27  ;;  %p382_p5 = scmp.lt.s32.totalorder %s376_s27, %s376_s27 }
   0xc   :  { %p383_p6 = por %p382_p5, %p381_p4 }
   0xe   :  { %p384_p7 = pnand %p383_p6, %p377_p3 }
  0x10   :  { %387 = shalt.err (!%p384_p7)
}
  0x11   :  { %s461_s28 = smov 128   ;;  %s462_s29 = smov 8  }
  0x12   :  { %34 = dma.hbm_to_vmem [thread:$0]  %s558_s1, 512, %s29_s19, [#allocation6], %s461_s28, %s461_s28, %s462_s29  }
  0x13   :  { %s463_s7 = smov [#allocation2]   ;;  %s464_s9 = smov [#allocation7]  }
  0x14   :  { %s19_s8 = sshll.u32 %s463_s7, 4  ;;  %s42_s10 = sshll.u32 %s464_s9, 4  ;;  %s20_s8 = int_to_ptr.vmem [resolvable:$true] %s19_s8  ;;  %s43_s10 = int_to_ptr.vmem [resolvable:$true] %s42_s10 }
  0x15   :  { %s388_s13 = scalar_lea.hbm %s557_s0, 64 }
  0x16   :  { %p389_p8 = scmp.ne.s32.totalorder %s557_s0, %s388_s13  ;;  %p392_p9 = scmp.lt.u32.totalorder %s388_s13, %s557_s0 }
  0x18   :  { %p394_p10 = pnand %p392_p9, %p389_p8 }
  0x1a   :  { %397 = shalt.err (!%p394_p10)
}
  0x1b   :  { %s398_s1 = scalar_lea.vmem %s20_s8, 64  ;;  %p403_p12 = scmp.lt.s32.totalorder %s20_s8, %s20_s8 }
  0x1c   :  { %p399_p11 = scmp.ne.s32.totalorder %s20_s8, %s398_s1  ;;  %p404_p13 = scmp.lt.s32.totalorder %s398_s1, %s398_s1 }
  0x1e   :  { %p405_p0 = por %p404_p13, %p403_p12 }
  0x20   :  { %p406_p1 = pnand %p405_p0, %p399_p11 }
  0x22   :  { %409 = shalt.err (!%p406_p1)
}
  0x23   :  { %22 = dma.hbm_to_vmem [thread:$0]  %s557_s0, 64, %s20_s8, [#allocation3]  }
  0x24   :  { %s410_s22 = scalar_lea.hbm %s560_s3, 2048 }
  0x25   :  { %p411_p2 = scmp.ne.s32.totalorder %s560_s3, %s410_s22  ;;  %p414_p3 = scmp.lt.u32.totalorder %s410_s22, %s560_s3 }
  0x27   :  { %p416_p4 = pnand %p414_p3, %p411_p2 }
  0x29   :  { %419 = shalt.err (!%p416_p4)
}
  0x2a   :  { %s420_s27 = scalar_lea.vmem %s43_s10, 2048  ;;  %p425_p6 = scmp.lt.s32.totalorder %s43_s10, %s43_s10 }
  0x2b   :  { %p421_p5 = scmp.ne.s32.totalorder %s43_s10, %s420_s27  ;;  %p426_p7 = scmp.lt.s32.totalorder %s420_s27, %s420_s27 }
  0x2d   :  { %p427_p8 = por %p426_p7, %p425_p6 }
  0x2f   :  { %p428_p9 = pnand %p427_p8, %p421_p5 }
  0x31   :  { %431 = shalt.err (!%p428_p9)
}
  0x32   :  { %48 = dma.hbm_to_vmem [thread:$0]  %s560_s3, 2048, %s43_s10, [#allocation6], %s461_s28, %s461_s28, %s462_s29  }
  0x33   :  { %454 = dma.done.wait [#allocation3], 64  }
  0x34   :  { %455 = vsyncadd [#allocation3], 4294967232 }
  0x35   :  { %456 = dma.done.wait [#allocation6], 2560  }
  0x36   :  { %457 = vsyncadd [#allocation6], 4294964736  ;;  %v465_v0 = vmov 0   ;;  %v336_v1 = vld [vmem:[#allocation5 + $0x4] ss:$8 sps:$4 sm:$0xff]   ;;  %vm98_vm0 = vcmask 261120   ;;  %v68_v22 = vlaneseq }
  0x37   :  { %134 = vmatprep.mubr.bf16.mxu0 %v465_v0  ;;  %v338_v2 = vld [vmem:[#allocation5] ss:$8 sps:$4 sm:$0xff]   ;;  %102 = vmatprep.subr.bf16.mxu0 %v336_v1  ;;  %v339_v3 = vld [vmem:[#allocation5 + $0x14] ss:$8 sps:$4 sm:$0xff]   ;;  %v341_v4 = vld [vmem:[#allocation5 + $0x10] ss:$8 sps:$4 sm:$0xff]  }
  0x38   :  { %103 = vmatpush1.bf16.msra.mxu0 %v338_v2  ;;  %v342_v5 = vld [vmem:[#allocation7 + $0x4] ss:$8 sps:$4 sm:$0xff]   ;;  %v344_v6 = vld [vmem:[#allocation7] ss:$8 sps:$4 sm:$0xff]   ;;  %v345_v7 = vld [vmem:[#allocation7 + $0x14] ss:$8 sps:$4 sm:$0xff]  }
  0x39   :  { %104 = vmatprep.subr.bf16.mxu0 %v339_v3  ;;  %250 = vmatprep.subr.bf16.mxu1 %v342_v5  ;;  %v61_v8 = vld [vmem:[#allocation2] sm:$0xf]  ;;  %v347_v9 = vld [vmem:[#allocation7 + $0x10] ss:$8 sps:$4 sm:$0xff]   ;;  %v348_v10 = vld [vmem:[#allocation7 + $0x24] ss:$8 sps:$4 sm:$0xff]  }
  0x3a   :  { %251 = vmatpush1.bf16.xpose.msra.mxu1 %v344_v6  ;;  %v350_v11 = vld [vmem:[#allocation7 + $0x20] ss:$8 sps:$4 sm:$0xff]   ;;  %v351_v12 = vld [vmem:[#allocation7 + $0x34] ss:$8 sps:$4 sm:$0xff]   ;;  %v353_v13 = vld [vmem:[#allocation7 + $0x30] ss:$8 sps:$4 sm:$0xff]  }
  0x3b   :  { %252 = vmatprep.subr.bf16.mxu1 %v345_v7  ;;  %v354_v14 = vld [vmem:[#allocation7 + $0x44] ss:$8 sps:$4 sm:$0xff]   ;;  %v356_v15 = vld [vmem:[#allocation7 + $0x40] ss:$8 sps:$4 sm:$0xff]   ;;  %v357_v16 = vld [vmem:[#allocation7 + $0x54] ss:$8 sps:$4 sm:$0xff]  }
  0x3c   :  { %105 = vmatpush1.bf16.msra.mxu0 %v341_v4  ;;  %v359_v17 = vld [vmem:[#allocation7 + $0x50] ss:$8 sps:$4 sm:$0xff]   ;;  %v360_v18 = vld [vmem:[#allocation7 + $0x64] ss:$8 sps:$4 sm:$0xff]   ;;  %v362_v19 = vld [vmem:[#allocation7 + $0x60] ss:$8 sps:$4 sm:$0xff]  }
  0x3d   :  { %v363_v20 = vld [vmem:[#allocation7 + $0x74] ss:$8 sps:$4 sm:$0xff]   ;;  %v365_v21 = vld [vmem:[#allocation7 + $0x70] ss:$8 sps:$4 sm:$0xff]   ;;  %v69_v23 = vshrl.u32 %v68_v22, 7 }
  0x3e   :  { %v66_v25 = vld [vmem:[%s559_s2] sm:$0x3]  ;;  %s466_s2 = smov [#allocation8]  }
  0x3f   :  { %311 = vmatmul.mubr.msk.bf16.vlgmr.msra.gmra.mrb[0].mxu0 %vm98_vm0, %v61_v8  ;;  %v70_v24 = vsub.s32 0, %v69_v23  ;;  %v74_v26 = vsub.s32 1, %v69_v23  ;;  %v312_v39 = vld [vmem:[%s561_s4] ss:$0 sm:$0xff]  ;;  %s297_s7 = sshll.u32 %s466_s2, 4  ;;  %s298_s7 = int_to_ptr.vmem [resolvable:$true] %s297_s7 }
  0x40   :  { %s432_s8 = scalar_lea.vmem %s298_s7, 128  ;;  %p437_p11 = scmp.lt.s32.totalorder %s298_s7, %s298_s7 }
  0x41   :  { %v71_v27 = vrot.slane %v66_v25, %v70_v24  ;;  %v75_v28 = vrot.slane %v66_v25, %v74_v26  ;;  %p433_p10 = scmp.ne.s32.totalorder %s298_s7, %s432_s8  ;;  %p438_p12 = scmp.lt.s32.totalorder %s432_s8, %s432_s8 }
  0x42   :  { %253 = vmatpush1.bf16.xpose.msra.mxu1 %v347_v9 }
  0x43   :  { %254 = vmatprep.subr.bf16.mxu1 %v348_v10  ;;  %p439_p13 = por %p438_p12, %p437_p11 }
  0x45   :  { %p440_p0 = pnand %p439_p13, %p433_p10 }
  0x4a   :  { %255 = vmatpush1.bf16.xpose.msra.mxu1 %v350_v11 }
  0x4b   :  { %256 = vmatprep.subr.bf16.mxu1 %v351_v12 }
  0x52   :  { %257 = vmatpush1.bf16.xpose.msra.mxu1 %v353_v13 }
  0x53   :  { %258 = vmatprep.subr.bf16.mxu1 %v354_v14 }
  0x5a   :  { %259 = vmatpush1.bf16.xpose.msra.mxu1 %v356_v15 }
  0x5b   :  { %260 = vmatprep.subr.bf16.mxu1 %v357_v16 }
  0x62   :  { %261 = vmatpush1.bf16.xpose.msra.mxu1 %v359_v17 }
  0x63   :  { %262 = vmatprep.subr.bf16.mxu1 %v360_v18 }
  0x6a   :  { %263 = vmatpush1.bf16.xpose.msra.mxu1 %v362_v19 }
  0x6b   :  { %264 = vmatprep.subr.bf16.mxu1 %v363_v20 }
  0x72   :  { %265 = vmatpush1.bf16.xpose.msra.mxu1 %v365_v21 }
 0x112   :  { %v136_v29 = vpop.f32.mrb[0].mxu0 }
 0x113   :  { %v137_v30 = vadd.f32 %v136_v29, %v71_v27  ;;  %v138_v31 = vpop.f32.mrb[1].mxu0 }
 0x114   :  { %v139_v32 = vadd.f32 %v138_v31, %v75_v28  ;;  %v140_v33 = vpop.f32.mrb[2].mxu0 }
 0x115   :  { %v143_v34 = vmax.f32 %v137_v30, 0.0  ;;  %v141_v35 = vpop.f32.mrb[3].mxu0 }
 0x116   :  { %v144_v36 = vmax.f32 %v139_v32, 0.0 }
 0x117   :  { %v145_v38 = vpack.c.bf16 %v143_v34, %v143_v34 }
 0x118   :  { %v146_v37 = vpack.c.bf16 %v144_v36, %v144_v36 }
 0x11a   :  { %282 = vmatprep.mubr.bf16.mxu1 %v146_v37 }
 0x11b   :  { %283 = vmatmul.mubr.bf16.vlgmr.msra.gmra.mrb[0].mxu1 %v145_v38 }
 0x1ee   :  { %v284_v40 = vpop.f32.mrb[0].mxu1 }
 0x1ef   :  { %v285_v41 = vadd.f32 %v312_v39, %v284_v40  ;;  %v286_v42 = vpop.f32.mrb[1].mxu1 }
 0x1f0   :  { %v287_v43 = vpop.f32.mrb[2].mxu1 }
 0x1f1   :  { %290 = vst [vmem:[#allocation8] sm:$0xff] %v285_v41  ;;  %v288_v44 = vpop.f32.mrb[3].mxu1 }
 0x1f2   :  { %443 = shalt.err (!%p440_p0)
}
 0x1f3   :  { %s444_s4 = scalar_lea.hbm %s562_s5, 128 }
 0x1f4   :  { %p445_p1 = scmp.ne.s32.totalorder %s562_s5, %s444_s4  ;;  %p448_p2 = scmp.lt.u32.totalorder %s444_s4, %s562_s5 }
 0x1f6   :  { %p450_p3 = pnand %p448_p2, %p445_p1 }
 0x1f8   :  { %453 = shalt.err (!%p450_p3)
}
 0x1f9   :  { %300 = dma.vmem_to_hbm [thread:$0]  %s298_s7, 128, %s562_s5, [#allocation4]  }
 0x1fa   :  { %458 = dma.done.wait [#allocation4], 128  }
 0x1fb   :  { %459 = vsyncadd [#allocation4], 4294967168 }
 0x1fc   :  { %304 = vsyncpa [#allocation3], 1 }
 0x1fd   :  { %305 = vsyncpa [#allocation6], 1 }
 0x1fe   :  { %306 = vsyncpa [#allocation4], 1 }

</bundles_post_ra>
